<compile_context>
chip_gen: v6e
topology: v6e:2x2x1
jax: 0.10.0
libtpu: 0.0.40
codegen_flags: <defaults>
</compile_context>

<pallas_src>
import jax
import jax.numpy as jnp
from jax.experimental import pallas as pl
from jax.experimental.pallas import tpu as pltpu

_LANE = 128
_VMEM_BUDGET_BYTES = 12 * 1024 * 1024   # conservative planning budget (all gens)
_VMEM_LIMIT_BYTES = 32 * 1024 * 1024    # explicit scoped-VMEM request to Mosaic


def _round_up(x, m):
    return ((x + m - 1) // m) * m


def _round_down(x, m):
    return (x // m) * m


# ----------------------------------------------------------------------------
# Kernels
# ----------------------------------------------------------------------------
def _dimreduce_kernel(x_ref, w_ref, shift_ref, o_ref):
    # x_ref:     (tm, Din)       tile of flattened input rows
    # w_ref:     (Din, Dout_pad) fused weight (W^T * bn_scale), grid-invariant
    # shift_ref: (1,  Dout_pad)  fused shift  (bias*bn_scale + bn_shift), f32
    # o_ref:     (tm, Dout_pad)  lane-dense (Dout_pad % 128 == 0)
    z = jnp.dot(x_ref[...], w_ref[...], preferred_element_type=jnp.float32)
    o_ref[...] = jnp.maximum(z + shift_ref[...], 0.0).astype(o_ref.dtype)


def _dimreduce_kernel_ktiled(x_ref, w_ref, shift_ref, o_ref, acc_ref):
    # Din-tiled variant for weights too large to keep resident in VMEM.
    k = pl.program_id(1)

    @pl.when(k == 0)
    def _init():
        acc_ref[...] = jnp.zeros_like(acc_ref)

    acc_ref[...] += jnp.dot(x_ref[...], w_ref[...],
                            preferred_element_type=jnp.float32)

    @pl.when(k == pl.num_programs(1) - 1)
    def _finalize():
        o_ref[...] = jnp.maximum(acc_ref[...] + shift_ref[...], 0.0
                                 ).astype(o_ref.dtype)


# ----------------------------------------------------------------------------
# Tiling heuristics
# ----------------------------------------------------------------------------
def _pick_tile_m(M, Din, Dout_pad, x_isize, out_isize, vmem_budget_bytes):
    """Row tile for the weight-resident path.

    Weight + shift budgeted single-buffered; x tile and out tile double-buffered.
    Capped at 512 (roofline ~saturated), clamped so the block never exceeds the
    array rows, and split into >=2 grid steps for larger M (v7x megacore).
    """
    align = 16 if x_isize == 2 else 8
    const_bytes = x_isize * Din * Dout_pad + 4 * Dout_pad
    per_row = 2 * (x_isize * Din + out_isize * Dout_pad)
    tm_fit = (vmem_budget_bytes - const_bytes) // max(per_row, 1)
    tm_fit = _round_down(int(tm_fit), align)

    tm = min(512, max(align, tm_fit))
    if M < align:
        return M                                   # full-dim block for tiny M
    tm = min(tm, _round_down(M, align))            # block rows never exceed M
    if M >= 4 * align:                             # keep >=2 steps for megacore
        tm = min(tm, max(align, _round_up(pl.cdiv(M, 2), align)))
    return max(align, tm)


def _choose_tk_dividing(Din, tk_max):
    """Largest multiple of 128 that divides Din and is <= tk_max (0 if none)."""
    best = 0
    cand = _LANE
    limit = min(Din, tk_max)
    while cand <= limit:
        if Din % cand == 0:
            best = cand
        cand += _LANE
    return best


# ----------------------------------------------------------------------------
# pallas_call wrappers
# ----------------------------------------------------------------------------
def _const_spec_kwargs(single_buffer):
    if single_buffer and hasattr(pl, "Buffered"):
        return {"pipeline_mode": pl.Buffered(1)}
    return {}


def _call_simple(x2d, w_fused, shift_fused, Dout_pad, out_dtype, tm,
                 single_buffer_consts):
    M, Din = x2d.shape
    x_isize = jnp.dtype(x2d.dtype).itemsize
    out_isize = jnp.dtype(out_dtype).itemsize
    ck = _const_spec_kwargs(single_buffer_consts)

    cost = pl.CostEstimate(
        flops=2 * M * Din * Dout_pad,
        transcendentals=0,
        bytes_accessed=(x_isize * (M * Din + Din * Dout_pad)
                        + out_isize * M * Dout_pad),
    )
    return pl.pallas_call(
        _dimreduce_kernel,
        out_shape=jax.ShapeDtypeStruct((M, Dout_pad), out_dtype),
        grid_spec=pltpu.PrefetchScalarGridSpec(
            num_scalar_prefetch=0,
            grid=(pl.cdiv(M, tm),),
            in_specs=[
                pl.BlockSpec((tm, Din), lambda i: (i, 0)),
                pl.BlockSpec((Din, Dout_pad), lambda i: (0, 0), **ck),
                pl.BlockSpec((1, Dout_pad), lambda i: (0, 0), **ck),
            ],
            out_specs=pl.BlockSpec((tm, Dout_pad), lambda i: (i, 0)),
        ),
        compiler_params=pltpu.CompilerParams(
            dimension_semantics=("parallel",),
            vmem_limit_bytes=_VMEM_LIMIT_BYTES,
        ),
        cost_estimate=cost,
    )(x2d, w_fused, shift_fused)


def _call_ktiled(x2d, w_fused, shift_fused, Dout_pad, out_dtype, tm, tk,
                 single_buffer_consts):
    M, Din = x2d.shape                      # Din already a multiple of tk
    x_isize = jnp.dtype(x2d.dtype).itemsize
    out_isize = jnp.dtype(out_dtype).itemsize
    ck = _const_spec_kwargs(single_buffer_consts)

    cost = pl.CostEstimate(
        flops=2 * M * Din * Dout_pad,
        transcendentals=0,
        bytes_accessed=(x_isize * (M * Din + Din * Dout_pad)
                        + out_isize * M * Dout_pad),
    )
    return pl.pallas_call(
        _dimreduce_kernel_ktiled,
        out_shape=jax.ShapeDtypeStruct((M, Dout_pad), out_dtype),
        grid_spec=pltpu.PrefetchScalarGridSpec(
            num_scalar_prefetch=0,
            grid=(pl.cdiv(M, tm), Din // tk),
            in_specs=[
                pl.BlockSpec((tm, tk), lambda i, k: (i, k)),
                pl.BlockSpec((tk, Dout_pad), lambda i, k: (k, 0)),
                pl.BlockSpec((1, Dout_pad), lambda i, k: (0, 0), **ck),
            ],
            out_specs=pl.BlockSpec((tm, Dout_pad), lambda i, k: (i, 0)),
            scratch_shapes=[pltpu.VMEM((tm, Dout_pad), jnp.float32)],
        ),
        compiler_params=pltpu.CompilerParams(
            dimension_semantics=("parallel", "arbitrary"),
            vmem_limit_bytes=_VMEM_LIMIT_BYTES,
        ),
        cost_estimate=cost,
    )(x2d, w_fused, shift_fused)


def _dimreduce_2d(x2d, w_fused, shift_fused, out_dim, *, ktile=None,
                  out_dtype=jnp.float32,
                  vmem_budget_bytes=_VMEM_BUDGET_BYTES):
    M, Din = x2d.shape
    Dout_pad = w_fused.shape[1]
    x_isize = jnp.dtype(x2d.dtype).itemsize
    out_isize = jnp.dtype(out_dtype).itemsize
    align = 16 if x_isize == 2 else 8

    if ktile is None:
        tm = _pick_tile_m(M, Din, Dout_pad, x_isize, out_isize,
                          vmem_budget_bytes)

        def run(single_buffer):
            return _call_simple(x2d, w_fused, shift_fused, Dout_pad,
                                out_dtype, tm, single_buffer)
    else:
        Din_w = w_fused.shape[0]
        if Din_w != Din:
            # TODO(synk): rare fallback (huge Din not a multiple of 128) pads x
            # columns once so garbage never reaches valid output rows.
            x_in = jnp.pad(x2d, ((0, 0), (0, Din_w - Din)))
        else:
            x_in = x2d
        if M < align:
            tm = M
        else:
            tm = min(256, max(align, _round_down(M, align)))

        def run(single_buffer):
            return _call_ktiled(x_in, w_fused, shift_fused, Dout_pad,
                                out_dtype, tm, ktile, single_buffer)

    try:
        out = run(True)      # single-buffer the grid-invariant operands
    except Exception:        # pragma: no cover - pipeline_mode lowering fallback
        out = run(False)

    if Dout_pad != out_dim:
        out = out[:, :out_dim]
    return out


# ----------------------------------------------------------------------------
# Layer
# ----------------------------------------------------------------------------
class AfterPoolingDimReduceLayerPallas:
    """JAX/Pallas port of AfterPoolingDimReduceLayer (dropout_p=None path)."""

    def __init__(self, input_dim, output_dim, key, *,
                 compute_dtype=jnp.float32,
                 vmem_budget_bytes=_VMEM_BUDGET_BYTES):
        self.input_dim = input_dim
        self.output_dim = output_dim
        self.compute_dtype = compute_dtype
        self.vmem_budget_bytes = vmem_budget_bytes

        # nn.Linear init: weight ~ N(0, 0.01), torch shape (out, in); bias = 0
        w = 0.01 * jax.random.normal(key, (output_dim, input_dim), jnp.float32)
        self.wT = jnp.transpose(w)                         # (Din, Dout)
        self.bias = jnp.zeros((output_dim,), jnp.float32)

        # nn.BatchNorm1d init: gamma=1, beta=0, running_mean=0, running_var=1
        self.eps = 1e-5
        self.gamma = jnp.ones((output_dim,), jnp.float32)
        self.beta = jnp.zeros((output_dim,), jnp.float32)
        self.running_mean = jnp.zeros((output_dim,), jnp.float32)
        self.running_var = jnp.ones((output_dim,), jnp.float32)

        # Fold Linear bias + eval-mode BN affine into weight/shift once.
        s = self.gamma / jnp.sqrt(self.running_var + self.eps)      # (Dout,)
        shift = self.bias * s + (self.beta - self.running_mean * s)  # (Dout,)
        wT_fused = self.wT * s[None, :]                              # (Din, Dout)

        # Lane-dense output: pad Dout to a multiple of 128 with zero columns
        # (relu(0 + 0) = 0, sliced off in the wrapper).
        Dout_pad = _round_up(output_dim, _LANE)
        w_p = jnp.zeros((input_dim, Dout_pad), jnp.float32)
        w_p = w_p.at[:, :output_dim].set(wT_fused)
        shift_p = jnp.zeros((1, Dout_pad), jnp.float32)
        shift_p = shift_p.at[:, :output_dim].set(shift[None, :])
        self.Dout_pad = Dout_pad

        # Decide weight-resident vs Din-tiled path against the VMEM budget.
        x_isize = jnp.dtype(compute_dtype).itemsize
        out_isize = 4
        align = 16 if x_isize == 2 else 8
        min_simple = (x_isize * input_dim * Dout_pad + 4 * Dout_pad
                      + 2 * align * (x_isize * input_dim + out_isize * Dout_pad))
        if min_simple <= vmem_budget_bytes:
            self.ktile = None
        else:
            tm_k = 256
            fixed = (2 * tm_k * Dout_pad * out_isize
                     + tm_k * Dout_pad * 4 + 4 * Dout_pad)
            per_tk = 2 * tm_k * x_isize + 2 * Dout_pad * x_isize
            tk_fit = (vmem_budget_bytes - fixed) // max(per_tk, 1)
            tk_cap = max(_LANE, _round_down(int(tk_fit), _LANE))
            tk = _choose_tk_dividing(input_dim, tk_cap)
            if tk == 0:
                tk = min(tk_cap, _round_up(input_dim, _LANE))
                din_pad = _round_up(input_dim, tk)
            else:
                din_pad = input_dim
            self.ktile = tk
            if din_pad != input_dim:
                w_big = jnp.zeros((din_pad, Dout_pad), jnp.float32)
                w_p = w_big.at[:input_dim, :].set(w_p)

        self.w_fused = w_p.astype(compute_dtype)
        self.shift_fused = shift_p                  # keep shift / epilogue in f32

    def __call__(self, x):
        x = jnp.asarray(x, self.compute_dtype)
        if x.ndim == 3:
            N, K, D = x.shape
            assert D == self.input_dim
            y2d = _dimreduce_2d(x.reshape(N * K, D), self.w_fused,
                                self.shift_fused, self.output_dim,
                                ktile=self.ktile,
                                vmem_budget_bytes=self.vmem_budget_bytes)
            return y2d.reshape(N, K, self.output_dim)
        assert x.ndim == 2 and x.shape[1] == self.input_dim
        return _dimreduce_2d(x, self.w_fused, self.shift_fused,
                             self.output_dim, ktile=self.ktile,
                             vmem_budget_bytes=self.vmem_budget_bytes)


def _reference(x, layer):
    """Unfused reference with the original PyTorch evaluation order."""
    orig_shape = x.shape
    if x.ndim == 3:
        x = x.reshape(-1, x.shape[-1])
    z = x.astype(jnp.float32) @ layer.wT + layer.bias[None, :]
    z = (z - layer.running_mean) / jnp.sqrt(layer.running_var + layer.eps)
    z = z * layer.gamma + layer.beta
    y = jnp.maximum(z, 0.0)
    if len(orig_shape) == 3:
        y = y.reshape(orig_shape[0], orig_shape[1], -1)
    return y


if __name__ == "__main__":
    key = jax.random.PRNGKey(0)
    kw, kx, kk = jax.random.split(key, 3)

    N, K, input_dim, output_dim = 2, 8, 32, 16
    layer = AfterPoolingDimReduceLayerPallas(input_dim, output_dim, kw)

    # 3-D case (N, K, Din) — flattened to (N*K, Din) like the PyTorch branch.
    x3 = jax.random.normal(kx, (N, K, input_dim), jnp.float32)
    y3 = jax.block_until_ready(layer(x3))
    ref3 = _reference(x3, layer)
    assert y3.shape == (N, K, output_dim)
    assert jnp.allclose(y3, ref3, atol=1e-5, rtol=1e-5)

    # 2-D case.
    x2 = x3.reshape(N * K, input_dim)
    y2 = jax.block_until_ready(layer(x2))
    ref2 = _reference(x2, layer)
    assert y2.shape == (N * K, output_dim)
    assert jnp.allclose(y2, ref2, atol=1e-5, rtol=1e-5)

    # Ragged row count (M not a multiple of the tile) — exercises the partial
    # last row-block path (no host-side pad of x).
    xr = x2[:13]
    yr = jax.block_until_ready(layer(xr))
    refr = _reference(xr, layer)
    assert yr.shape == (13, output_dim)
    assert jnp.allclose(yr, refr, atol=1e-5, rtol=1e-5)

    # Din-tiled accumulator fallback, forced via a tiny VMEM planning budget,
    # with a ragged M to exercise partial row-blocks in that path too.
    layer_k = AfterPoolingDimReduceLayerPallas(256, 16, kw,
                                               vmem_budget_bytes=128 * 1024)
    assert layer_k.ktile is not None
    xk = jax.random.normal(kk, (50, 256), jnp.float32)
    yk = jax.block_until_ready(layer_k(xk))
    refk = _reference(xk, layer_k)
    assert yk.shape == (50, 16)
    assert jnp.allclose(yk, refk, atol=1e-5, rtol=1e-5)

    print("KERNEL_OK")
</pallas_src>

<mosaic_0001>
module attributes {stable_mosaic.version = 11 : i64} {
  func.func @_dimreduce_kernel(%arg0: i32, %arg1: memref<16x32xf32, #tpu.memory_space<vmem>>, %arg2: memref<32x128xf32, #tpu.memory_space<vmem>>, %arg3: memref<1x128xf32, #tpu.memory_space<vmem>>, %arg4: memref<16x128xf32, #tpu.memory_space<vmem>>) attributes {dimension_semantics = [#tpu.dimension_semantics<parallel>], iteration_bounds = array<i64: 1>, scalar_prefetch = 0 : i64, scratch_operands = 0 : i64, tpu.core_type = #tpu.core_type<tc>, window_params = [{transform_indices = @transform_0, window_bounds = array<i64: 16, 32>}, {pipeline_mode = #tpu.pipeline_mode<synchronous>, transform_indices = @transform_1, window_bounds = array<i64: 32, 128>}, {pipeline_mode = #tpu.pipeline_mode<synchronous>, transform_indices = @transform_2, window_bounds = array<i64: 1, 128>}, {transform_indices = @transform_3, window_bounds = array<i64: 16, 128>}]} {
    %c0 = arith.constant 0 : index
    %c0_0 = arith.constant 0 : index
    %0 = vector.load %arg1[%c0, %c0_0] : memref<16x32xf32, #tpu.memory_space<vmem>>, vector<16x32xf32>
    %c0_1 = arith.constant 0 : index
    %c0_2 = arith.constant 0 : index
    %1 = vector.load %arg2[%c0_1, %c0_2] : memref<32x128xf32, #tpu.memory_space<vmem>>, vector<32x128xf32>
    %cst = arith.constant dense<0.000000e+00> : vector<16x128xf32>
    %2 = tpu.matmul %0, %1, %cst {dimension_numbers = #tpu.dot_dimension_numbers<[1], [0], [0], [1], [0, 0, 1, 1], [], []>} : vector<16x32xf32>, vector<32x128xf32>, vector<16x128xf32> -> vector<16x128xf32>
    %c0_3 = arith.constant 0 : index
    %c0_4 = arith.constant 0 : index
    %3 = vector.load %arg3[%c0_3, %c0_4] : memref<1x128xf32, #tpu.memory_space<vmem>>, vector<1x128xf32>
    %4 = vector.broadcast %3 : vector<1x128xf32> to vector<16x128xf32>
    %5 = arith.addf %2, %4 : vector<16x128xf32>
    %cst_5 = arith.constant 0.000000e+00 : f32
    %6 = vector.broadcast %cst_5 : f32 to vector<16x128xf32>
    %7 = arith.maximumf %5, %6 : vector<16x128xf32>
    %c0_6 = arith.constant 0 : index
    %c0_7 = arith.constant 0 : index
    %8 = vector.load %arg4[%c0_6, %c0_7] : memref<16x128xf32, #tpu.memory_space<vmem>>, vector<16x128xf32>
    tpu.vector_store %arg4[%c0_6, %c0_7], %7 {strides = array<i32>} : memref<16x128xf32, #tpu.memory_space<vmem>>, vector<16x128xf32>,
    return
  }
  func.func @transform_0(%arg0: i32) -> (i32, i32) {
    %c0_i32 = arith.constant 0 : i32
    %c0_i32_0 = arith.constant 0 : i32
    return %arg0, %c0_i32 : i32, i32
  }
  func.func @transform_1(%arg0: i32) -> (i32, i32) {
    %c0_i32 = arith.constant 0 : i32
    %c0_i32_0 = arith.constant 0 : i32
    %c0_i32_1 = arith.constant 0 : i32
    return %c0_i32, %c0_i32_0 : i32, i32
  }
  func.func @transform_2(%arg0: i32) -> (i32, i32) {
    %c0_i32 = arith.constant 0 : i32
    %c0_i32_0 = arith.constant 0 : i32
    %c0_i32_1 = arith.constant 0 : i32
    return %c0_i32, %c0_i32_0 : i32, i32
  }
  func.func @transform_3(%arg0: i32) -> (i32, i32) {
    %c0_i32 = arith.constant 0 : i32
    %c0_i32_0 = arith.constant 0 : i32
    return %arg0, %c0_i32 : i32, i32
  }
}

module attributes {stable_mosaic.version = 11 : i64} {
  func.func @_dimreduce_kernel(%arg0: i32, %arg1: memref<16x32xf32, #tpu.memory_space<vmem>>, %arg2: memref<32x128xf32, #tpu.memory_space<vmem>>, %arg3: memref<1x128xf32, #tpu.memory_space<vmem>>, %arg4: memref<16x128xf32, #tpu.memory_space<vmem>>) attributes {dimension_semantics = [#tpu.dimension_semantics<parallel>], iteration_bounds = array<i64: 1>, scalar_prefetch = 0 : i64, scratch_operands = 0 : i64, tpu.core_type = #tpu.core_type<tc>, window_params = [{transform_indices = @transform_0, window_bounds = array<i64: 16, 32>}, {pipeline_mode = #tpu.pipeline_mode<synchronous>, transform_indices = @transform_1, window_bounds = array<i64: 32, 128>}, {pipeline_mode = #tpu.pipeline_mode<synchronous>, transform_indices = @transform_2, window_bounds = array<i64: 1, 128>}, {transform_indices = @transform_3, window_bounds = array<i64: 16, 128>}]} {
    %c0 = arith.constant 0 : index
    %c0_0 = arith.constant 0 : index
    %0 = vector.load %arg1[%c0, %c0_0] : memref<16x32xf32, #tpu.memory_space<vmem>>, vector<16x32xf32>
    %c0_1 = arith.constant 0 : index
    %c0_2 = arith.constant 0 : index
    %1 = vector.load %arg2[%c0_1, %c0_2] : memref<32x128xf32, #tpu.memory_space<vmem>>, vector<32x128xf32>
    %cst = arith.constant dense<0.000000e+00> : vector<16x128xf32>
    %2 = tpu.matmul %0, %1, %cst {dimension_numbers = #tpu.dot_dimension_numbers<[1], [0], [0], [1], [0, 0, 1, 1], [], []>} : vector<16x32xf32>, vector<32x128xf32>, vector<16x128xf32> -> vector<16x128xf32>
    %c0_3 = arith.constant 0 : index
    %c0_4 = arith.constant 0 : index
    %3 = vector.load %arg3[%c0_3, %c0_4] : memref<1x128xf32, #tpu.memory_space<vmem>>, vector<1x128xf32>
    %4 = vector.broadcast %3 : vector<1x128xf32> to vector<16x128xf32>
    %5 = arith.addf %2, %4 : vector<16x128xf32>
    %cst_5 = arith.constant 0.000000e+00 : f32
    %6 = vector.broadcast %cst_5 : f32 to vector<16x128xf32>
    %7 = arith.maximumf %5, %6 : vector<16x128xf32>
    %c0_6 = arith.constant 0 : index
    %c0_7 = arith.constant 0 : index
    %8 = vector.load %arg4[%c0_6, %c0_7] : memref<16x128xf32, #tpu.memory_space<vmem>>, vector<16x128xf32>
    tpu.vector_store %arg4[%c0_6, %c0_7], %7 {strides = array<i32>} : memref<16x128xf32, #tpu.memory_space<vmem>>, vector<16x128xf32>,
    return
  }
  func.func @transform_0(%arg0: i32) -> (i32, i32) {
    %c0_i32 = arith.constant 0 : i32
    %c0_i32_0 = arith.constant 0 : i32
    return %arg0, %c0_i32 : i32, i32
  }
  func.func @transform_1(%arg0: i32) -> (i32, i32) {
    %c0_i32 = arith.constant 0 : i32
    %c0_i32_0 = arith.constant 0 : i32
    %c0_i32_1 = arith.constant 0 : i32
    return %c0_i32, %c0_i32_0 : i32, i32
  }
  func.func @transform_2(%arg0: i32) -> (i32, i32) {
    %c0_i32 = arith.constant 0 : i32
    %c0_i32_0 = arith.constant 0 : i32
    %c0_i32_1 = arith.constant 0 : i32
    return %c0_i32, %c0_i32_0 : i32, i32
  }
  func.func @transform_3(%arg0: i32) -> (i32, i32) {
    %c0_i32 = arith.constant 0 : i32
    %c0_i32_0 = arith.constant 0 : i32
    return %arg0, %c0_i32 : i32, i32
  }
}

</mosaic_0001>

<bundles_post_ra>
// kernel: tpu_custom_call.1
= control target key start
LH: loop header
LB: loop body
LE: loop exit
PB: predicated region body
PF: predicated region fallthrough
CT: control target
= control target key end

     0   :  { %8 = vsyncpa [#allocation3], 0  ;;  %s299_s0 = inlined_call_operand.hbm [shape: f32[16,32], index: 0, kind: input, shape index: {}]   ;;  %s300_s1 = inlined_call_operand.hbm [shape: f32[32,128], index: 1, kind: input, shape index: {}]   ;;  %s301_s2 = inlined_call_operand.vmem [shape: f32[1,128], index: 2, kind: input, shape index: {}]   ;;  %s302_s3 = inlined_call_operand.hbm [shape: f32[16,128], index: 3, kind: output, shape index: {}]  }
   0x1   :  { %9 = vsyncpa [#allocation6], 0 }
   0x2   :  { %10 = vsyncpa [#allocation4], 0  ;;  %s251_s12 = smov [#allocation2]  }
   0x3   :  { %s16_s13 = sshll.u32 %s251_s12, 4  ;;  %s17_s13 = int_to_ptr.vmem [resolvable:$true] %s16_s13 }
   0x4   :  { %s193_s14 = scalar_lea.vmem %s17_s13, 256  ;;  %p198_p1 = scmp.lt.s32.totalorder %s17_s13, %s17_s13 }
   0x5   :  { %p194_p0 = scmp.ne.s32.totalorder %s17_s13, %s193_s14  ;;  %p199_p2 = scmp.lt.s32.totalorder %s193_s14, %s193_s14 }
   0x7   :  { %p200_p3 = por %p199_p2, %p198_p1 }
   0x9   :  { %p201_p4 = pnand %p200_p3, %p194_p0 }
   0xb   :  { %204 = shalt.err (!%p201_p4)
}
   0xc   :  { %s252_s15 = smov 128   ;;  %s253_s16 = smov 8  }
   0xd   :  { %22 = dma.hbm_to_vmem [thread:$0]  %s299_s0, 256, %s17_s13, [#allocation3], %s252_s15, %s252_s15, %s253_s16  }
   0xe   :  { %s254_s19 = smov [#allocation5]  }
   0xf   :  { %s28_s20 = sshll.u32 %s254_s19, 4  ;;  %s29_s20 = int_to_ptr.vmem [resolvable:$true] %s28_s20 }
  0x10   :  { %s213_s21 = scalar_lea.vmem %s29_s20, 512  ;;  %p218_p6 = scmp.lt.s32.totalorder %s29_s20, %s29_s20 }
  0x11   :  { %p214_p5 = scmp.ne.s32.totalorder %s29_s20, %s213_s21  ;;  %p219_p7 = scmp.lt.s32.totalorder %s213_s21, %s213_s21 }
  0x13   :  { %p220_p8 = por %p219_p7, %p218_p6 }
  0x15   :  { %p221_p9 = pnand %p220_p8, %p214_p5 }
  0x17   :  { %224 = shalt.err (!%p221_p9)
}
  0x18   :  { %34 = dma.hbm_to_vmem [thread:$0]  %s300_s1, 512, %s29_s20, [#allocation6], %s252_s15, %s252_s15, %s253_s16  }
  0x19   :  { %245 = dma.done.wait [#allocation3], 256  }
  0x1a   :  { %246 = vsyncadd [#allocation3], 4294967040 }
  0x1b   :  { %247 = dma.done.wait [#allocation6], 512  }
  0x1c   :  { %248 = vsyncadd [#allocation6], 4294966784  ;;  %vm56_vm0 = vcmask 261120   ;;  %v48_v0 = vld [vmem:[#allocation5 + $0x18] sm:$0xff]  ;;  %v47_v1 = vld [vmem:[#allocation5 + $0x10] sm:$0xff]  ;;  %s255_s24 = smov [#allocation7]  }
  0x1d   :  { %169 = vmatprep.subr.mxu0 %v48_v0  ;;  %v43_v2 = vld [vmem:[#allocation2] sm:$0xff]  ;;  %v46_v3 = vld [vmem:[#allocation5 + $0x8] sm:$0xff]  ;;  %v45_v4 = vld [vmem:[#allocation5] sm:$0xff]  ;;  %s147_s25 = sshll.u32 %s255_s24, 4  ;;  %s148_s25 = int_to_ptr.vmem [resolvable:$true] %s147_s25 }
  0x1e   :  { %170 = vmatpush3.msra.mxu0 %v48_v0  ;;  %177 = vmatprep.mubr.msk.f32.mxu0 %vm56_vm0, %v43_v2  ;;  %v44_v5 = vld [vmem:[#allocation2 + $0x8] sm:$0xff]  ;;  %v160_v6 = vld [vmem:[%s301_s2] ss:$0 sm:$0xff]  ;;  %s225_s26 = scalar_lea.vmem %s148_s25, 256  ;;  %p230_p11 = scmp.lt.s32.totalorder %s148_s25, %s148_s25 }
  0x1f   :  { %171 = vmatprep.subr.mxu0 %v47_v1  ;;  %p226_p10 = scmp.ne.s32.totalorder %s148_s25, %s225_s26  ;;  %p231_p12 = scmp.lt.s32.totalorder %s225_s26, %s225_s26 }
  0x20   :  { %172 = vmatpush3.msra.mxu0 %v47_v1 }
  0x21   :  { %173 = vmatprep.subr.mxu0 %v46_v3  ;;  %p232_p13 = por %p231_p12, %p230_p11 }
  0x22   :  { %174 = vmatpush3.msra.mxu0 %v46_v3 }
  0x23   :  { %175 = vmatprep.subr.mxu0 %v45_v4  ;;  %p233_p0 = pnand %p232_p13, %p226_p10 }
  0x24   :  { %176 = vmatpush3.msra.mxu0 %v45_v4 }
  0x25   :  { %178 = vmatmul.mubr.msk.f32.vlgmr.msra.gmra.mxu0 %vm56_vm0, %v44_v5 }
  0xe5   :  { %v179_v7 = vpop.f32.mrf.mxu0 }
  0xe6   :  { %v135_v8 = vadd.f32 %v179_v7, %v160_v6 }
  0xe7   :  { %v129_v9 = vpop.f32.mrf.mxu0 }
  0xe8   :  { %v139_v10 = vmax.f32 %v135_v8, 0.0  ;;  %v130_v11 = vadd.f32 %v160_v6, %v129_v9 }
  0xea   :  { %141 = vst [vmem:[#allocation7 + $0x8] sm:$0xff] %v139_v10  ;;  %v138_v12 = vmax.f32 %v130_v11, 0.0 }
  0xec   :  { %140 = vst [vmem:[#allocation7] sm:$0xff] %v138_v12 }
  0xed   :  { %236 = shalt.err (!%p233_p0)
}
  0xee   :  { %153 = dma.vmem_to_hbm [thread:$0]  %s148_s25, 256, %s302_s3, [#allocation4], %s252_s15, %s252_s15, %s253_s16  }
  0xef   :  { %249 = dma.done.wait [#allocation4], 256  }
  0xf0   :  { %250 = vsyncadd [#allocation4], 4294967040 }
  0xf1   :  { %157 = vsyncpa [#allocation3], 1 }
  0xf2   :  { %158 = vsyncpa [#allocation6], 1 }
  0xf3   :  { %159 = vsyncpa [#allocation4], 1 }

// kernel: tpu_custom_call.1
= control target key start
LH: loop header
LB: loop body
LE: loop exit
PB: predicated region body
PF: predicated region fallthrough
CT: control target
= control target key end

     0   :  { %8 = vsyncpa [#allocation3], 0  ;;  %s299_s0 = inlined_call_operand.hbm [shape: f32[16,32], index: 0, kind: input, shape index: {}]   ;;  %s300_s1 = inlined_call_operand.hbm [shape: f32[32,128], index: 1, kind: input, shape index: {}]   ;;  %s301_s2 = inlined_call_operand.vmem [shape: f32[1,128], index: 2, kind: input, shape index: {}]   ;;  %s302_s3 = inlined_call_operand.hbm [shape: f32[16,128], index: 3, kind: output, shape index: {}]  }
   0x1   :  { %9 = vsyncpa [#allocation6], 0 }
   0x2   :  { %10 = vsyncpa [#allocation4], 0  ;;  %s251_s12 = smov [#allocation2]  }
   0x3   :  { %s16_s13 = sshll.u32 %s251_s12, 4  ;;  %s17_s13 = int_to_ptr.vmem [resolvable:$true] %s16_s13 }
   0x4   :  { %s193_s14 = scalar_lea.vmem %s17_s13, 256  ;;  %p198_p1 = scmp.lt.s32.totalorder %s17_s13, %s17_s13 }
   0x5   :  { %p194_p0 = scmp.ne.s32.totalorder %s17_s13, %s193_s14  ;;  %p199_p2 = scmp.lt.s32.totalorder %s193_s14, %s193_s14 }
   0x7   :  { %p200_p3 = por %p199_p2, %p198_p1 }
   0x9   :  { %p201_p4 = pnand %p200_p3, %p194_p0 }
   0xb   :  { %204 = shalt.err (!%p201_p4)
}
   0xc   :  { %s252_s15 = smov 128   ;;  %s253_s16 = smov 8  }
   0xd   :  { %22 = dma.hbm_to_vmem [thread:$0]  %s299_s0, 256, %s17_s13, [#allocation3], %s252_s15, %s252_s15, %s253_s16  }
   0xe   :  { %s254_s19 = smov [#allocation5]  }
   0xf   :  { %s28_s20 = sshll.u32 %s254_s19, 4  ;;  %s29_s20 = int_to_ptr.vmem [resolvable:$true] %s28_s20 }
  0x10   :  { %s213_s21 = scalar_lea.vmem %s29_s20, 512  ;;  %p218_p6 = scmp.lt.s32.totalorder %s29_s20, %s29_s20 }
  0x11   :  { %p214_p5 = scmp.ne.s32.totalorder %s29_s20, %s213_s21  ;;  %p219_p7 = scmp.lt.s32.totalorder %s213_s21, %s213_s21 }
  0x13   :  { %p220_p8 = por %p219_p7, %p218_p6 }
  0x15   :  { %p221_p9 = pnand %p220_p8, %p214_p5 }
  0x17   :  { %224 = shalt.err (!%p221_p9)
}
  0x18   :  { %34 = dma.hbm_to_vmem [thread:$0]  %s300_s1, 512, %s29_s20, [#allocation6], %s252_s15, %s252_s15, %s253_s16  }
  0x19   :  { %245 = dma.done.wait [#allocation3], 256  }
  0x1a   :  { %246 = vsyncadd [#allocation3], 4294967040 }
  0x1b   :  { %247 = dma.done.wait [#allocation6], 512  }
  0x1c   :  { %248 = vsyncadd [#allocation6], 4294966784  ;;  %vm56_vm0 = vcmask 261120   ;;  %v48_v0 = vld [vmem:[#allocation5 + $0x18] sm:$0xff]  ;;  %v47_v1 = vld [vmem:[#allocation5 + $0x10] sm:$0xff]  ;;  %s255_s24 = smov [#allocation7]  }
  0x1d   :  { %169 = vmatprep.subr.mxu0 %v48_v0  ;;  %v43_v2 = vld [vmem:[#allocation2] sm:$0xff]  ;;  %v46_v3 = vld [vmem:[#allocation5 + $0x8] sm:$0xff]  ;;  %v45_v4 = vld [vmem:[#allocation5] sm:$0xff]  ;;  %s147_s25 = sshll.u32 %s255_s24, 4  ;;  %s148_s25 = int_to_ptr.vmem [resolvable:$true] %s147_s25 }
  0x1e   :  { %170 = vmatpush3.msra.mxu0 %v48_v0  ;;  %177 = vmatprep.mubr.msk.f32.mxu0 %vm56_vm0, %v43_v2  ;;  %v44_v5 = vld [vmem:[#allocation2 + $0x8] sm:$0xff]  ;;  %v160_v6 = vld [vmem:[%s301_s2] ss:$0 sm:$0xff]  ;;  %s225_s26 = scalar_lea.vmem %s148_s25, 256  ;;  %p230_p11 = scmp.lt.s32.totalorder %s148_s25, %s148_s25 }
  0x1f   :  { %171 = vmatprep.subr.mxu0 %v47_v1  ;;  %p226_p10 = scmp.ne.s32.totalorder %s148_s25, %s225_s26  ;;  %p231_p12 = scmp.lt.s32.totalorder %s225_s26, %s225_s26 }
  0x20   :  { %172 = vmatpush3.msra.mxu0 %v47_v1 }
  0x21   :  { %173 = vmatprep.subr.mxu0 %v46_v3  ;;  %p232_p13 = por %p231_p12, %p230_p11 }
  0x22   :  { %174 = vmatpush3.msra.mxu0 %v46_v3 }
  0x23   :  { %175 = vmatprep.subr.mxu0 %v45_v4  ;;  %p233_p0 = pnand %p232_p13, %p226_p10 }
  0x24   :  { %176 = vmatpush3.msra.mxu0 %v45_v4 }
  0x25   :  { %178 = vmatmul.mubr.msk.f32.vlgmr.msra.gmra.mxu0 %vm56_vm0, %v44_v5 }
  0xe5   :  { %v179_v7 = vpop.f32.mrf.mxu0 }
  0xe6   :  { %v135_v8 = vadd.f32 %v179_v7, %v160_v6 }
  0xe7   :  { %v129_v9 = vpop.f32.mrf.mxu0 }
  0xe8   :  { %v139_v10 = vmax.f32 %v135_v8, 0.0  ;;  %v130_v11 = vadd.f32 %v160_v6, %v129_v9 }
  0xea   :  { %141 = vst [vmem:[#allocation7 + $0x8] sm:$0xff] %v139_v10  ;;  %v138_v12 = vmax.f32 %v130_v11, 0.0 }
  0xec   :  { %140 = vst [vmem:[#allocation7] sm:$0xff] %v138_v12 }
  0xed   :  { %236 = shalt.err (!%p233_p0)
}
  0xee   :  { %153 = dma.vmem_to_hbm [thread:$0]  %s148_s25, 256, %s302_s3, [#allocation4], %s252_s15, %s252_s15, %s253_s16  }
  0xef   :  { %249 = dma.done.wait [#allocation4], 256  }
  0xf0   :  { %250 = vsyncadd [#allocation4], 4294967040 }
  0xf1   :  { %157 = vsyncpa [#allocation3], 1 }
  0xf2   :  { %158 = vsyncpa [#allocation6], 1 }
  0xf3   :  { %159 = vsyncpa [#allocation4], 1 }

</bundles_post_ra>
